<compile_context>
chip_gen: v7x
topology: tpu7x:2x2x1
jax: 0.10.0
libtpu: 0.0.40
codegen_flags: <defaults>
</compile_context>

<pallas_src>
import functools
import math

import jax
import jax.numpy as jnp
from jax.experimental import pallas as pl
from jax.experimental.pallas import tpu as pltpu


def _round_up(a, b):
    return (a + b - 1) // b * b


def _chip_flavor():
    """Classify the local TPU generation for kernel knobs."""
    try:
        kind = jax.devices()[0].device_kind.lower()
    except Exception:
        kind = ""
    is_v7 = ("v7" in kind) or ("tpu7" in kind)
    # v5e and earlier lack bf16 VALUs -> keep elementwise dequant in f32 there.
    is_old = any(s in kind for s in ("v2", "v3", "v4", "v5"))
    return is_old, is_v7


# ----------------------------------------------------------------------------
# Quantization helper (setup glue, mirrors block_quantize_4bit)
# ----------------------------------------------------------------------------
def block_quantize_4bit(x_flat, group_size=16):
    x = x_flat.reshape(-1, group_size)
    normalization = jnp.max(jnp.abs(x), axis=-1, keepdims=True)
    # Guard all-zero groups (the torch version divides by zero -> NaN weights).
    safe = jnp.maximum(normalization, 1e-12)
    x_norm = (x + safe) / (2.0 * safe)
    # NOTE: jnp.round is half-to-even vs torch.round half-away-from-zero;
    # exactly-half values can differ by 1 LSB (setup/reference concern only).
    q8 = jnp.round(x_norm * 15.0).astype(jnp.int8)
    q4 = (q8[:, ::2] & 15) + ((q8[:, 1::2] & 15) << 4)
    return q4.astype(jnp.int8), normalization.astype(jnp.float16)


# ----------------------------------------------------------------------------
# In-kernel dequantization helper (shared by both fused kernels)
# ----------------------------------------------------------------------------
def _dequant_weights(wq_ref, slo_ref, shi_ref, dq_dtype):
    q = wq_ref[...].astype(jnp.int32)          # uint8 -> 0..255 (zero-extend)
    lo = (q & 15).astype(dq_dtype)             # -> W[:, c]          (c <  K/2)
    hi = (q >> 4).astype(dq_dtype)             # -> W[:, K/2 + c]  (no mask: q >= 0)

    gb, _, tn = slo_ref.shape                  # groups in this K tile
    tk2 = lo.shape[0]
    gs = tk2 // gb                             # group_size (static)
    half = jnp.asarray(7.5, dq_dtype)

    def expand_scale(s_ref):                   # (gb, 1, tn) -> (tk2, tn)
        s = s_ref[...].astype(dq_dtype)                   # bf16 storage
        s3 = jnp.broadcast_to(s, (gb, gs, tn))            # sublane broadcast
        return s3.reshape(tk2, tn)                        # tile-preserving merge

    # dequant:  q/15*2*nrm - nrm  ==  (q - 7.5) * (nrm * 2/15)   (scale pre-folded)
    w_lo = ((lo - half) * expand_scale(slo_ref)).astype(jnp.bfloat16)
    w_hi = ((hi - half) * expand_scale(shi_ref)).astype(jnp.bfloat16)
    return w_lo, w_hi


# ----------------------------------------------------------------------------
# Pallas kernels
# ----------------------------------------------------------------------------
def _linear4bit_kernel_nk1(xlo_ref, xhi_ref, wq_ref, slo_ref, shi_ref, b_ref,
                           o_ref, *, dq_dtype):
    # K/2 fully VMEM-resident: no accumulator scratch, single write to o_ref.
    w_lo, w_hi = _dequant_weights(wq_ref, slo_ref, shi_ref, dq_dtype)
    acc = jnp.dot(xlo_ref[...], w_lo, preferred_element_type=jnp.float32)
    acc = acc + jnp.dot(xhi_ref[...], w_hi, preferred_element_type=jnp.float32)
    o_ref[...] = (acc + b_ref[...]).astype(o_ref.dtype)


def _linear4bit_kernel_acc(xlo_ref, xhi_ref, wq_ref, slo_ref, shi_ref, b_ref,
                           o_ref, acc_ref, *, dq_dtype):
    k = pl.program_id(2)
    w_lo, w_hi = _dequant_weights(wq_ref, slo_ref, shi_ref, dq_dtype)
    acc = jnp.dot(xlo_ref[...], w_lo, preferred_element_type=jnp.float32)
    acc = acc + jnp.dot(xhi_ref[...], w_hi, preferred_element_type=jnp.float32)

    @pl.when(k == 0)
    def _():
        acc_ref[...] = acc              # write, don't zero-init + add

    @pl.when(k > 0)
    def _():
        acc_ref[...] += acc

    @pl.when(k == pl.num_programs(2) - 1)
    def _():
        o_ref[...] = (acc_ref[...] + b_ref[...]).astype(o_ref.dtype)


def _matmul_bias_kernel(x_ref, w_ref, b_ref, o_ref, acc_ref):
    # Plain bf16 MXU matmul + bias for the pre-dequantized large-M path.
    k = pl.program_id(2)
    acc = jnp.dot(x_ref[...], w_ref[...], preferred_element_type=jnp.float32)

    @pl.when(k == 0)
    def _():
        acc_ref[...] = acc

    @pl.when(k > 0)
    def _():
        acc_ref[...] += acc

    @pl.when(k == pl.num_programs(2) - 1)
    def _():
        o_ref[...] = (acc_ref[...] + b_ref[...]).astype(o_ref.dtype)


# ----------------------------------------------------------------------------
# One-time parameter repack (analogous to from_float / state-dict pre-hook)
# ----------------------------------------------------------------------------
def prepare_linear4bit_params(weight_q4, weight_norm, bias, out_features,
                              in_features, group_size=16):
    """Repack module buffers for the kernel.

    Returns:
      wq_t : (K/2, N_pad) uint8 -- low nibble = W.T[c, :], high = W.T[K/2+c, :]
      s_t  : (K/group, 1, N_pad) bf16 -- per-group norm * 2/15, transposed, compact
      b_row: (1, N_pad) f32
    """
    N, K = out_features, in_features
    assert K % group_size == 0 and group_size % 2 == 0
    # TODO(synk): support group_size not a multiple of 16 (needs a different
    # sublane-broadcast layout for the compact scales).
    assert group_size % 16 == 0, "kernel assumes group_size is a multiple of 16"
    # TODO(synk): support in_features not divisible by 256 (needs group-aware K padding).
    assert K % 256 == 0, "in_features must be a multiple of 256"
    K2 = K // 2
    G = K // group_size

    # Unpack module layout: byte j of row n = W_q[n, 2j] | (W_q[n, 2j+1] << 4).
    q = weight_q4.astype(jnp.int32).reshape(N, K2)
    lo = q & 15
    hi = (q >> 4) & 15
    qfull = jnp.stack([lo, hi], axis=-1).reshape(N, K)      # 0..15, original col order

    # Repack: transposed, contiguous-half nibble pairing, UNSIGNED bytes.
    qt = qfull.T                                            # (K, N)
    wq_t = (qt[:K2] | (qt[K2:] << 4)).astype(jnp.uint8)     # (K2, N), 0..255

    # Compact per-group scales, 2/15 folded in, stored bf16 (HBM traffic),
    # transposed, with a unit sublane dim so the in-kernel broadcast is a plain
    # size-1 sublane broadcast.
    s_t = (weight_norm.astype(jnp.float32).reshape(N, G) * (2.0 / 15.0)).T   # (G, N)
    s_t = s_t.reshape(G, 1, N).astype(jnp.bfloat16)

    b = bias if bias is not None else jnp.zeros((N,), jnp.float32)
    b = b.astype(jnp.float32)

    n_pad = _round_up(max(N, 128), 128)
    if n_pad != N:
        wq_t = jnp.pad(wq_t, ((0, 0), (0, n_pad - N)))
        s_t = jnp.pad(s_t, ((0, 0), (0, 0), (0, n_pad - N)))
        b = jnp.pad(b, (0, n_pad - N))
    return wq_t, s_t, b.reshape(1, n_pad)


def _predequant_weight(wq_t, s_t, group_size):
    """One-shot dequantization of the packed weights -> (K, N_pad) bf16."""
    K2, n_pad = wq_t.shape
    q = wq_t.astype(jnp.int32)                               # 0..255
    nib = jnp.concatenate([q & 15, q >> 4], axis=0).astype(jnp.float32)  # (K, n_pad)
    G = s_t.shape[0]
    gs = (2 * K2) // G
    scale = s_t.astype(jnp.float32)                          # (G, 1, n_pad)
    w = (nib.reshape(G, gs, n_pad) - 7.5) * scale
    return w.reshape(2 * K2, n_pad).astype(jnp.bfloat16)


# ----------------------------------------------------------------------------
# Forward pass
# ----------------------------------------------------------------------------
_PREDEQUANT_MIN_M = 1024   # above this, dequantize W once, run plain bf16 matmul


def linear4bit_apply(x, wq_t, s_t, b_row, out_features, in_features,
                     group_size=16):
    N, K = out_features, in_features
    K2, n_pad = wq_t.shape
    gs = group_size
    lead = x.shape[:-1]
    M = int(math.prod(lead)) if lead else 1

    is_old, is_v7 = _chip_flavor()
    dq_dtype = jnp.float32 if is_old else jnp.bfloat16       # bf16 VALU on v6e/v7x
    vmem_limit = (32 if is_v7 else 64) * 1024 * 1024         # v7x: 64 MiB physical

    xb = x.reshape(M, K).astype(jnp.bfloat16)

    # --- M tiling (floor 16 for bf16 packing; large tm amortizes dequant) -----
    if M >= 2048:
        tm = 512
    elif M >= 512:
        tm = 256
    elif M >= 128:
        tm = 128
    else:
        tm = max(16, _round_up(M, 16))
    m_pad = _round_up(M, tm)
    if m_pad != M:
        xb = jnp.pad(xb, ((0, m_pad - M), (0, 0)))

    # --- N tiling --------------------------------------------------------------
    if n_pad % 512 == 0 and n_pad >= 2048 and M >= 512:
        tn = 512
    elif n_pad % 256 == 0 and n_pad >= 512:
        tn = 256
    else:
        tn = 128
    # Keep >= 2 parallel (i, j) tiles when possible so both v7x TCs get work.
    if (m_pad // tm) * (n_pad // tn) < 2 and n_pad >= 256:
        tn = 128
    grid_ij = (m_pad // tm, n_pad // tn)

    # --- large-M dispatch: pre-dequantize W, plain bf16 MXU matmul --------------
    if M >= _PREDEQUANT_MIN_M:
        # TODO(synk): cache the pre-dequantized weight across calls in real use.
        w_bf16 = _predequant_weight(wq_t, s_t, gs)           # (K, n_pad) bf16
        if K <= 2048:
            tk = K
        else:
            tk = 256
            for cand in (2048, 1024, 512):
                if K % cand == 0:
                    tk = cand
                    break
        nk = K // tk
        out = pl.pallas_call(
            _matmul_bias_kernel,
            out_shape=jax.ShapeDtypeStruct((m_pad, n_pad), jnp.float32),
            grid_spec=pltpu.PrefetchScalarGridSpec(
                num_scalar_prefetch=0,
                grid=grid_ij + (nk,),
                in_specs=[
                    pl.BlockSpec((tm, tk), lambda i, j, k: (i, k)),
                    pl.BlockSpec((tk, tn), lambda i, j, k: (k, j)),
                    pl.BlockSpec((1, tn), lambda i, j, k: (0, j)),
                ],
                out_specs=pl.BlockSpec((tm, tn), lambda i, j, k: (i, j)),
                scratch_shapes=[pltpu.VMEM((tm, tn), jnp.float32)],
            ),
            compiler_params=pltpu.CompilerParams(
                dimension_semantics=("parallel", "parallel", "arbitrary"),
                vmem_limit_bytes=vmem_limit,
            ),
        )(xb, w_bf16, b_row)
        return out[:M, :N].reshape(*lead, N)

    # --- K tiling for the fused dequant kernel ----------------------------------
    max_tk2 = 1024 if is_v7 else 2048          # v7x: smaller K blocks (64 MiB VMEM)
    if K2 <= max_tk2:
        tk2 = K2                               # single reduction step
    else:
        tk2 = 128
        for cand in (2048, 1024, 512, 256):
            if cand <= max_tk2 and K2 % cand == 0:
                tk2 = cand
                break
    assert tk2 % 128 == 0 and tk2 % gs == 0
    nk = K2 // tk2                             # reduction steps
    gb = tk2 // gs                             # groups per K tile

    in_specs = [
        # x, low-half columns  [k*tk2, (k+1)*tk2)
        pl.BlockSpec((tm, tk2), lambda i, j, k: (i, k)),
        # x, high-half columns [K/2 + k*tk2, ...)  (same array, offset blocks)
        pl.BlockSpec((tm, tk2), lambda i, j, k, nk=nk: (i, k + nk)),
        # packed unsigned weights (K/2, N_pad)
        pl.BlockSpec((tk2, tn), lambda i, j, k: (k, j)),
        # compact per-group bf16 scales (G, 1, N_pad): low / high halves
        pl.BlockSpec((gb, 1, tn), lambda i, j, k: (k, 0, j)),
        pl.BlockSpec((gb, 1, tn), lambda i, j, k, nk=nk: (k + nk, 0, j)),
        # bias
        pl.BlockSpec((1, tn), lambda i, j, k: (0, j)),
    ]
    out_spec = pl.BlockSpec((tm, tn), lambda i, j, k: (i, j))

    if nk == 1:
        kernel = functools.partial(_linear4bit_kernel_nk1, dq_dtype=dq_dtype)
        scratch = []
    else:
        kernel = functools.partial(_linear4bit_kernel_acc, dq_dtype=dq_dtype)
        scratch = [pltpu.VMEM((tm, tn), jnp.float32)]

    out = pl.pallas_call(
        kernel,
        out_shape=jax.ShapeDtypeStruct((m_pad, n_pad), jnp.float32),
        grid_spec=pltpu.PrefetchScalarGridSpec(
            num_scalar_prefetch=0,
            grid=grid_ij + (nk,),
            in_specs=in_specs,
            out_specs=out_spec,
            scratch_shapes=scratch,
        ),
        compiler_params=pltpu.CompilerParams(
            dimension_semantics=("parallel", "parallel", "arbitrary"),
            vmem_limit_bytes=vmem_limit,
        ),
    )(xb, xb, wq_t, s_t, s_t, b_row)

    return out[:M, :N].reshape(*lead, N)


def linear4bit_forward(x, weight_q4, weight_norm, bias, out_features,
                       in_features, group_size=16):
    """Equivalent of Linear4Bit.forward (repack is one-time / amortized in practice)."""
    wq_t, s_t, b_row = prepare_linear4bit_params(
        weight_q4, weight_norm, bias, out_features, in_features, group_size)
    return linear4bit_apply(x, wq_t, s_t, b_row, out_features, in_features,
                            group_size)


# ----------------------------------------------------------------------------
# Pure-JAX reference (mirrors block_dequantize_4bit + F.linear)
# ----------------------------------------------------------------------------
def reference_forward(x, weight_q4, weight_norm, bias, shape):
    nrm = weight_norm.astype(jnp.float32)             # (groups, 1)
    q = weight_q4.astype(jnp.int32)                   # (groups, group//2)
    lo = (q & 15).astype(jnp.float32)
    hi = ((q >> 4) & 15).astype(jnp.float32)
    q8 = jnp.stack([lo, hi], axis=-1).reshape(q.shape[0], q.shape[1] * 2)
    w = q8 / 15.0 * 2.0 * nrm - nrm
    W = w.reshape(shape)                              # (out, in)
    y = jnp.einsum("...k,nk->...n", x, W, precision=jax.lax.Precision.HIGHEST)
    if bias is not None:
        y = y + bias
    return y


if __name__ == "__main__":
    # Small shapes consistent with the module: in_features = 256, out_features = 128,
    # batch = 2, seq = 8, group_size = 16.
    in_features, out_features, group_size = 256, 128, 16
    batch, seq = 2, 8

    key = jax.random.PRNGKey(0)
    kw, kb, kx, kx2 = jax.random.split(key, 4)

    # Deterministic synthetic float weight -> quantize to 4-bit module buffers
    # (same role as Linear4Bit.from_float / the state-dict pre-hook).
    weight_fp = jax.random.normal(kw, (out_features, in_features), jnp.float32) * 0.1
    weight_q4, weight_norm = block_quantize_4bit(weight_fp.reshape(-1), group_size)
    bias = jax.random.normal(kb, (out_features,), jnp.float32) * 0.1

    # One-time repack.
    wq_t, s_t, b_row = prepare_linear4bit_params(
        weight_q4, weight_norm, bias, out_features, in_features, group_size)

    # --- small (decode-like) M: fused 4-bit dequant + matmul kernel -------------
    x = jax.random.normal(kx, (batch, seq, in_features), jnp.float32)
    y = jax.block_until_ready(
        linear4bit_apply(x, wq_t, s_t, b_row, out_features, in_features, group_size))
    y_ref = jax.block_until_ready(
        reference_forward(x, weight_q4, weight_norm, bias, (out_features, in_features)))
    assert y.shape == (batch, seq, out_features)
    err_small = float(jnp.max(jnp.abs(y - y_ref)))
    assert err_small < 5e-2, f"small-M max abs err too large: {err_small}"

    # --- large M: exercises the pre-dequantized bf16 matmul dispatch path --------
    x_big = jax.random.normal(kx2, (_PREDEQUANT_MIN_M, in_features), jnp.float32)
    y_big = jax.block_until_ready(
        linear4bit_apply(x_big, wq_t, s_t, b_row, out_features, in_features, group_size))
    y_big_ref = jax.block_until_ready(
        reference_forward(x_big, weight_q4, weight_norm, bias, (out_features, in_features)))
    err_big = float(jnp.max(jnp.abs(y_big - y_big_ref)))
    assert err_big < 5e-2, f"large-M max abs err too large: {err_big}"

    print("KERNEL_OK")
</pallas_src>

<mosaic_0001>
module attributes {stable_mosaic.version = 11 : i64} {
  func.func @_linear4bit_kernel_nk1(%arg0: i32, %arg1: i32, %arg2: i32, %arg3: memref<16x128xbf16, #tpu.memory_space<vmem>>, %arg4: memref<16x128xbf16, #tpu.memory_space<vmem>>, %arg5: memref<128x128xi8, #tpu.memory_space<vmem>>, %arg6: memref<8x1x128xbf16, #tpu.memory_space<vmem>>, %arg7: memref<8x1x128xbf16, #tpu.memory_space<vmem>>, %arg8: memref<1x128xf32, #tpu.memory_space<vmem>>, %arg9: memref<16x128xf32, #tpu.memory_space<vmem>>) attributes {dimension_semantics = [#tpu.dimension_semantics<parallel>, #tpu.dimension_semantics<parallel>, #tpu.dimension_semantics<arbitrary>], iteration_bounds = array<i64: 1, 1, 1>, scalar_prefetch = 0 : i64, scratch_operands = 0 : i64, tpu.core_type = #tpu.core_type<tc>, window_params = [{transform_indices = @transform_0, window_bounds = array<i64: 16, 128>}, {transform_indices = @transform_1, window_bounds = array<i64: 16, 128>}, {transform_indices = @transform_2, window_bounds = array<i64: 128, 128>}, {transform_indices = @transform_3, window_bounds = array<i64: 8, 1, 128>}, {transform_indices = @transform_4, window_bounds = array<i64: 8, 1, 128>}, {transform_indices = @transform_5, window_bounds = array<i64: 1, 128>}, {transform_indices = @transform_6, window_bounds = array<i64: 16, 128>}]} {
    %c0 = arith.constant 0 : index
    %c0_0 = arith.constant 0 : index
    %0 = vector.load %arg5[%c0, %c0_0] : memref<128x128xi8, #tpu.memory_space<vmem>>, vector<128x128xi8>
    %1 = arith.extui %0 : vector<128x128xi8> to vector<128x128xi32>
    %c15_i32 = arith.constant 15 : i32
    %2 = vector.broadcast %c15_i32 : i32 to vector<128x128xi32>
    %3 = arith.andi %1, %2 : vector<128x128xi32>
    %4 = arith.sitofp %3 : vector<128x128xi32> to vector<128x128xbf16>
    %c4_i32 = arith.constant 4 : i32
    %5 = vector.broadcast %c4_i32 : i32 to vector<128x128xi32>
    %6 = arith.shrsi %1, %5 : vector<128x128xi32>
    %7 = arith.sitofp %6 : vector<128x128xi32> to vector<128x128xbf16>
    %cst = arith.constant 7.500000e+00 : bf16
    %8 = vector.broadcast %cst : bf16 to vector<128x128xbf16>
    %9 = arith.subf %4, %8 : vector<128x128xbf16>
    %c0_1 = arith.constant 0 : index
    %c0_2 = arith.constant 0 : index
    %c0_3 = arith.constant 0 : index
    %10 = vector.load %arg6[%c0_1, %c0_2, %c0_3] : memref<8x1x128xbf16, #tpu.memory_space<vmem>>, vector<8x1x128xbf16>
    %11 = vector.shape_cast %10 : vector<8x1x128xbf16> to vector<8x1x128xbf16>
    %12 = vector.broadcast %11 : vector<8x1x128xbf16> to vector<8x16x128xbf16>
    %13 = vector.shape_cast %12 : vector<8x16x128xbf16> to vector<128x128xbf16>
    %14 = arith.mulf %9, %13 : vector<128x128xbf16>
    %cst_4 = arith.constant 7.500000e+00 : bf16
    %15 = vector.broadcast %cst_4 : bf16 to vector<128x128xbf16>
    %16 = arith.subf %7, %15 : vector<128x128xbf16>
    %c0_5 = arith.constant 0 : index
    %c0_6 = arith.constant 0 : index
    %c0_7 = arith.constant 0 : index
    %17 = vector.load %arg7[%c0_5, %c0_6, %c0_7] : memref<8x1x128xbf16, #tpu.memory_space<vmem>>, vector<8x1x128xbf16>
    %18 = vector.shape_cast %17 : vector<8x1x128xbf16> to vector<8x1x128xbf16>
    %19 = vector.broadcast %18 : vector<8x1x128xbf16> to vector<8x16x128xbf16>
    %20 = vector.shape_cast %19 : vector<8x16x128xbf16> to vector<128x128xbf16>
    %21 = arith.mulf %16, %20 : vector<128x128xbf16>
    %c0_8 = arith.constant 0 : index
    %c0_9 = arith.constant 0 : index
    %22 = vector.load %arg3[%c0_8, %c0_9] : memref<16x128xbf16, #tpu.memory_space<vmem>>, vector<16x128xbf16>
    %cst_10 = arith.constant dense<0.000000e+00> : vector<16x128xf32>
    %23 = tpu.matmul %22, %14, %cst_10 {dimension_numbers = #tpu.dot_dimension_numbers<[1], [0], [0], [1], [0, 0, 1, 1], [], []>} : vector<16x128xbf16>, vector<128x128xbf16>, vector<16x128xf32> -> vector<16x128xf32>
    %c0_11 = arith.constant 0 : index
    %c0_12 = arith.constant 0 : index
    %24 = vector.load %arg4[%c0_11, %c0_12] : memref<16x128xbf16, #tpu.memory_space<vmem>>, vector<16x128xbf16>
    %cst_13 = arith.constant dense<0.000000e+00> : vector<16x128xf32>
    %25 = tpu.matmul %24, %21, %cst_13 {dimension_numbers = #tpu.dot_dimension_numbers<[1], [0], [0], [1], [0, 0, 1, 1], [], []>} : vector<16x128xbf16>, vector<128x128xbf16>, vector<16x128xf32> -> vector<16x128xf32>
    %26 = arith.addf %23, %25 : vector<16x128xf32>
    %c0_14 = arith.constant 0 : index
    %c0_15 = arith.constant 0 : index
    %27 = vector.load %arg8[%c0_14, %c0_15] : memref<1x128xf32, #tpu.memory_space<vmem>>, vector<1x128xf32>
    %28 = vector.broadcast %27 : vector<1x128xf32> to vector<16x128xf32>
    %29 = arith.addf %26, %28 : vector<16x128xf32>
    %c0_16 = arith.constant 0 : index
    %c0_17 = arith.constant 0 : index
    %30 = vector.load %arg9[%c0_16, %c0_17] : memref<16x128xf32, #tpu.memory_space<vmem>>, vector<16x128xf32>
    tpu.vector_store %arg9[%c0_16, %c0_17], %29 {strides = array<i32>} : memref<16x128xf32, #tpu.memory_space<vmem>>, vector<16x128xf32>,
    return
  }
  func.func @transform_0(%arg0: i32, %arg1: i32, %arg2: i32) -> (i32, i32) {
    %c0_i32 = arith.constant 0 : i32
    return %arg0, %arg2 : i32, i32
  }
  func.func @transform_1(%arg0: i32, %arg1: i32, %arg2: i32) -> (i32, i32) {
    %c1_i32 = arith.constant 1 : i32
    %0 = arith.addi %arg2, %c1_i32 : i32
    %c0_i32 = arith.constant 0 : i32
    return %arg0, %0 : i32, i32
  }
  func.func @transform_2(%arg0: i32, %arg1: i32, %arg2: i32) -> (i32, i32) {
    %c0_i32 = arith.constant 0 : i32
    return %arg2, %arg1 : i32, i32
  }
  func.func @transform_3(%arg0: i32, %arg1: i32, %arg2: i32) -> (i32, i32, i32) {
    %c0_i32 = arith.constant 0 : i32
    %c0_i32_0 = arith.constant 0 : i32
    return %arg2, %c0_i32, %arg1 : i32, i32, i32
  }
  func.func @transform_4(%arg0: i32, %arg1: i32, %arg2: i32) -> (i32, i32, i32) {
    %c1_i32 = arith.constant 1 : i32
    %0 = arith.addi %arg2, %c1_i32 : i32
    %c0_i32 = arith.constant 0 : i32
    %c0_i32_0 = arith.constant 0 : i32
    return %0, %c0_i32, %arg1 : i32, i32, i32
  }
  func.func @transform_5(%arg0: i32, %arg1: i32, %arg2: i32) -> (i32, i32) {
    %c0_i32 = arith.constant 0 : i32
    %c0_i32_0 = arith.constant 0 : i32
    return %c0_i32, %arg1 : i32, i32
  }
  func.func @transform_6(%arg0: i32, %arg1: i32, %arg2: i32) -> (i32, i32) {
    %c0_i32 = arith.constant 0 : i32
    return %arg0, %arg1 : i32, i32
  }
}

</mosaic_0001>

<bundles_post_ra>
// kernel: tpu_custom_call.1
= control target key start
LH: loop header
LB: loop body
LE: loop exit
PB: predicated region body
PF: predicated region fallthrough
CT: control target
= control target key end

     0   :  { %11 = vsyncpa [#allocation3], 0  ;;  %s1026_s0 = inlined_call_operand.hbm [shape: bf16[16,256], index: 0, kind: input, shape index: {}]   ;;  %s1027_s1 = inlined_call_operand.hbm [shape: bf16[16,256], index: 1, kind: input, shape index: {}]   ;;  %s1028_s2 = inlined_call_operand.hbm [shape: u8[128,128], index: 2, kind: input, shape index: {}]   ;;  %s1029_s3 = inlined_call_operand.hbm [shape: bf16[16,1,128], index: 3, kind: input, shape index: {}]   ;;  %s1030_s4 = inlined_call_operand.hbm [shape: bf16[16,1,128], index: 4, kind: input, shape index: {}]   ;;  %s1031_s5 = inlined_call_operand.hbm [shape: f32[1,128], index: 5, kind: input, shape index: {}]   ;;  %s1032_s6 = inlined_call_operand.hbm [shape: f32[16,128], index: 6, kind: output, shape index: {}]  }
   0x1   :  { %12 = vsyncpa [#allocation6], 0 }
   0x2   :  { %13 = vsyncpa [#allocation9], 0 }
   0x3   :  { %14 = vsyncpa [#allocation12], 0 }
   0x4   :  { %15 = vsyncpa [#allocation4], 0  ;;  %s826_s23 = scalar_lea.hbm %s1027_s1, 64  ;;  %s772_s24 = smov [#allocation5]  }
   0x5   :  { %s36_s25 = sshll.u32 %s772_s24, 4  ;;  %s773_s26 = smov [#allocation8]   ;;  %s37_s25 = int_to_ptr.vmem [resolvable:$true] %s36_s25 }
   0x6   :  { %s60_s27 = sshll.u32 %s773_s26, 4  ;;  %s626_s30 = scalar_lea.hbm %s1027_s1, 192  ;;  %s828_s27 = int_to_ptr.vmem [resolvable:$true] %s60_s27 }
   0x7   :  { %p603_p0 = scmp.ne.s32.totalorder %s826_s23, %s626_s30  ;;  %s604_s9 = scalar_lea.hbm %s1027_s1, 256 }
   0x8   :  { %p605_p1 = scmp.lt.u32.totalorder %s826_s23, %s1027_s1  ;;  %p606_p2 = scmp.lt.u32.totalorder %s604_s9, %s626_s30 }
   0x9   :  { %p608_p4 = scmp.lt.u32.totalorder %s626_s30, %s826_s23 }
   0xa   :  { %p607_p3 = por %p606_p2, %p605_p1 }
   0xc   :  { %p609_p5 = por %p608_p4, %p607_p3 }
   0xe   :  { %p610_p6 = pnand %p609_p5, %p603_p0 }
  0x10   :  { %613 = shalt.err (!%p610_p6)
}
  0x11   :  { %s614_s12 = scalar_lea.vmem %s37_s25, 128  ;;  %p619_p8 = scmp.lt.s32.totalorder %s37_s25, %s37_s25 }
  0x12   :  { %p615_p7 = scmp.ne.s32.totalorder %s37_s25, %s614_s12  ;;  %p620_p9 = scmp.lt.s32.totalorder %s614_s12, %s614_s12 }
  0x14   :  { %p621_p10 = por %p620_p9, %p619_p8 }
  0x16   :  { %p622_p11 = pnand %p621_p10, %p615_p7 }
  0x18   :  { %625 = shalt.err (!%p622_p11)
}
  0x19   :  { %s774_s13 = smov 128   ;;  %s775_s14 = smov 64  }
  0x1a   :  { %s776_s15 = smov 4   ;;  %s627_s17 = scalar_lea.hbm %s1029_s3, 128 }
  0x1b   :  { %42 = dma.hbm_to_vmem [thread:$0]  %s826_s23, 128, %s37_s25, [#allocation6], %s774_s13, %s775_s14, %s776_s15  }
  0x1c   :  { %p628_p12 = scmp.ne.s32.totalorder %s1029_s3, %s627_s17  ;;  %s629_s22 = scalar_lea.hbm %s1029_s3, 256 }
  0x1d   :  { %p630_p13 = scmp.lt.u32.totalorder %s629_s22, %s627_s17  ;;  %p631_p0 = scmp.lt.u32.totalorder %s627_s17, %s1029_s3 }
  0x1f   :  { %p632_p1 = por %p631_p0, %p630_p13 }
  0x21   :  { %p633_p2 = pnand %p632_p1, %p628_p12 }
  0x23   :  { %636 = shalt.err (!%p633_p2)
}
  0x24   :  { %s637_s23 = scalar_lea.vmem %s828_s27, 128  ;;  %p642_p4 = scmp.lt.s32.totalorder %s828_s27, %s828_s27 }
  0x25   :  { %p638_p3 = scmp.ne.s32.totalorder %s828_s27, %s637_s23  ;;  %p643_p5 = scmp.lt.s32.totalorder %s637_s23, %s637_s23 }
  0x27   :  { %p644_p6 = por %p643_p5, %p642_p4 }
  0x29   :  { %p645_p7 = pnand %p644_p6, %p638_p3 }
  0x2b   :  { %648 = shalt.err (!%p645_p7)
}
  0x2c   :  { %s777_s25 = smov 16   ;;  %s778_s28 = smov 1  }
  0x2d   :  { %66 = dma.hbm_to_vmem [thread:$0]  %s1029_s3, 128, %s828_s27, [#allocation9], %s777_s25, %s777_s25, %s778_s28  }
  0x2e   :  { %s779_s7 = smov [#allocation2]   ;;  %s780_s9 = smov [#allocation7]  }
  0x2f   :  { %s21_s8 = sshll.u32 %s779_s7, 4  ;;  %s48_s10 = sshll.u32 %s780_s9, 4  ;;  %s22_s8 = int_to_ptr.vmem [resolvable:$true] %s21_s8  ;;  %s869_s10 = int_to_ptr.vmem [resolvable:$true] %s48_s10 }
  0x30   :  { %s649_s1 = scalar_lea.hbm %s1026_s0, 128  ;;  %s651_s20 = scalar_lea.hbm %s1026_s0, 256 }
  0x31   :  { %p650_p8 = scmp.ne.s32.totalorder %s1026_s0, %s649_s1  ;;  %p652_p9 = scmp.lt.u32.totalorder %s651_s20, %s649_s1 }
  0x32   :  { %p653_p10 = scmp.lt.u32.totalorder %s649_s1, %s1026_s0 }
  0x34   :  { %p654_p11 = por %p653_p10, %p652_p9 }
  0x36   :  { %p655_p12 = pnand %p654_p11, %p650_p8 }
  0x38   :  { %658 = shalt.err (!%p655_p12)
}
  0x39   :  { %s659_s21 = scalar_lea.vmem %s22_s8, 128  ;;  %p664_p0 = scmp.lt.s32.totalorder %s22_s8, %s22_s8 }
  0x3a   :  { %p660_p13 = scmp.ne.s32.totalorder %s22_s8, %s659_s21  ;;  %p665_p1 = scmp.lt.s32.totalorder %s659_s21, %s659_s21 }
  0x3c   :  { %p666_p2 = por %p665_p1, %p664_p0 }
  0x3e   :  { %p667_p3 = pnand %p666_p2, %p660_p13 }
  0x40   :  { %670 = shalt.err (!%p667_p3)
}
  0x41   :  { %27 = dma.hbm_to_vmem [thread:$0]  %s1026_s0, 128, %s22_s8, [#allocation3], %s774_s13, %s775_s14, %s776_s15  }
  0x42   :  { %s892_s29 = scalar_lea.hbm %s1030_s4, 128  ;;  %s671_s9 = scalar_lea.hbm %s1028_s2, 512 }
  0x43   :  { %p672_p4 = scmp.ne.s32.totalorder %s1028_s2, %s671_s9  ;;  %p675_p5 = scmp.lt.u32.totalorder %s671_s9, %s1028_s2 }
  0x45   :  { %p677_p6 = pnand %p675_p5, %p672_p4 }
  0x47   :  { %680 = shalt.err (!%p677_p6)
}
  0x48   :  { %s681_s0 = scalar_lea.vmem %s869_s10, 512  ;;  %p686_p8 = scmp.lt.s32.totalorder %s869_s10, %s869_s10 }
  0x49   :  { %p682_p7 = scmp.ne.s32.totalorder %s869_s10, %s681_s0  ;;  %p687_p9 = scmp.lt.s32.totalorder %s681_s0, %s681_s0 }
  0x4b   :  { %p688_p10 = por %p687_p9, %p686_p8 }
  0x4d   :  { %p689_p11 = pnand %p688_p10, %p682_p7 }
  0x4f   :  { %692 = shalt.err (!%p689_p11)
}
  0x50   :  { %s781_s14 = smov 8   ;;  %s782_s17 = smov [#allocation10]  }
  0x51   :  { %54 = dma.hbm_to_vmem [thread:$0]  %s1028_s2, 512, %s869_s10, [#allocation6], %s774_s13, %s774_s13, %s781_s14  }
  0x52   :  { %s76_s18 = sshll.u32 %s782_s17, 4  ;;  %s783_s19 = smov [#allocation11]   ;;  %s77_s18 = int_to_ptr.vmem [resolvable:$true] %s76_s18 }
  0x53   :  { %s89_s20 = sshll.u32 %s783_s19, 4  ;;  %s717_s21 = scalar_lea.hbm %s1030_s4, 256  ;;  %s914_s20 = int_to_ptr.vmem [resolvable:$true] %s89_s20 }
  0x54   :  { %p694_p12 = scmp.ne.s32.totalorder %s892_s29, %s717_s21  ;;  %p696_p13 = scmp.lt.u32.totalorder %s892_s29, %s1030_s4 }
  0x55   :  { %p697_p0 = scmp.lt.u32.totalorder %s717_s21, %s717_s21  ;;  %p699_p2 = scmp.lt.u32.totalorder %s717_s21, %s892_s29 }
  0x57   :  { %p698_p1 = por %p697_p0, %p696_p13 }
  0x59   :  { %p700_p3 = por %p699_p2, %p698_p1 }
  0x5b   :  { %p701_p4 = pnand %p700_p3, %p694_p12 }
  0x5d   :  { %704 = shalt.err (!%p701_p4)
}
  0x5e   :  { %s705_s2 = scalar_lea.vmem %s77_s18, 128  ;;  %p710_p6 = scmp.lt.s32.totalorder %s77_s18, %s77_s18 }
  0x5f   :  { %p706_p5 = scmp.ne.s32.totalorder %s77_s18, %s705_s2  ;;  %p711_p7 = scmp.lt.s32.totalorder %s705_s2, %s705_s2 }
  0x61   :  { %p712_p8 = por %p711_p7, %p710_p6 }
  0x63   :  { %p713_p9 = pnand %p712_p8, %p706_p5 }
  0x65   :  { %716 = shalt.err (!%p713_p9)
}
  0x66   :  { %82 = dma.hbm_to_vmem [thread:$0]  %s892_s29, 128, %s77_s18, [#allocation9], %s777_s25, %s777_s25, %s778_s28  }
  0x67   :  { %s718_s26 = scalar_lea.hbm %s1031_s5, 16 }
  0x68   :  { %p719_p10 = scmp.ne.s32.totalorder %s1031_s5, %s718_s26  ;;  %p722_p11 = scmp.lt.u32.totalorder %s718_s26, %s1031_s5 }
  0x6a   :  { %p724_p12 = pnand %p722_p11, %p719_p10 }
  0x6c   :  { %727 = shalt.err (!%p724_p12)
}
  0x6d   :  { %s728_s11 = scalar_lea.vmem %s914_s20, 16  ;;  %s732_s25 = scalar_lea.vmem %s914_s20, 32 }
  0x6e   :  { %p729_p13 = scmp.ne.s32.totalorder %s914_s20, %s728_s11  ;;  %p733_p0 = scmp.lt.s32.totalorder %s914_s20, %s914_s20 }
  0x6f   :  { %p734_p1 = scmp.lt.s32.totalorder %s732_s25, %s728_s11 }
  0x71   :  { %p735_p2 = por %p734_p1, %p733_p0 }
  0x73   :  { %p736_p3 = pnand %p735_p2, %p729_p13 }
  0x75   :  { %739 = shalt.err (!%p736_p3)
}
  0x76   :  { %92 = dma.hbm_to_vmem [thread:$0]  %s1031_s5, 16, %s914_s20, [#allocation12]  }
  0x77   :  { %762 = dma.done.wait [#allocation3], 128  }
  0x78   :  { %763 = vsyncadd [#allocation3], 4294967168 }
  0x79   :  { %764 = dma.done.wait [#allocation6], 640  }
  0x7a   :  { %765 = vsyncadd [#allocation6], 4294966656 }
  0x7b   :  { %766 = dma.done.wait [#allocation9], 256  }
  0x7c   :  { %767 = vsyncadd [#allocation9], 4294967040 }
  0x7d   :  { %768 = dma.done.wait [#allocation12], 16  }
  0x7e   :  { %769 = vsyncadd [#allocation12], 4294967280  ;;  %v251_v0 = vlaneseq  ;;  %v784_v1 = vmov 0.0   ;;  %vm785_vm0 = vmmov 0   ;;  %v116_v4 = vld [vmem:[#allocation7] sm:$0xff]  ;;  %v117_v33 = vld [vmem:[#allocation7 + $0x8] sm:$0xff] }
  0x7f   :  { %544 = vmatprep.subr.bf16.mxu0 %v784_v1  ;;  %564 = vmatprep.subr.bf16.mxu1 %v784_v1  ;;  %v320_v5 = vld [vmem:[#allocation10] sm:$0x1]  ;;  %v240_v6 = vld [vmem:[#allocation8] sm:$0x1]  ;;  %v120_v7 = vunpack.c.0.s8 %v116_v4  ;;  %v121_v8 = vunpack.c.1.s8 %v116_v4  ;;  %v321_v11 = vld [vmem:[#allocation10 + $0x1] sm:$0x1]  ;;  %v122_v13 = vunpack.c.2.s8 %v116_v4  ;;  %v123_v14 = vunpack.c.3.s8 %v116_v4 }
  0x80   :  { %v252_v2 = vshrl.u32 %v251_v0, 7  ;;  %560 = vmatprep.mubr.msk.bf16.mxu0 %vm785_vm0, %v784_v1  ;;  %580 = vmatprep.mubr.msk.bf16.mxu1 %vm785_vm0, %v784_v1  ;;  %v329_v9 = vpack.i.b16 %v320_v5, %v320_v5  ;;  %v249_v10 = vpack.i.b16 %v240_v6, %v240_v6  ;;  %v241_v12 = vld [vmem:[#allocation8 + $0x1] sm:$0x1]  ;;  %v336_v15 = vpack.i.b16 %v321_v11, %v321_v11  ;;  %v322_v38 = vld [vmem:[#allocation10 + $0x2] sm:$0x1]  ;;  %s787_s5 = smov [#allocation13]  }
  0x81   :  { %v256_v16 = vpack.i.b16 %v241_v12, %v241_v12  ;;  %v136_v17 = vand.u32 255, %v120_v7  ;;  %v137_v18 = vand.u32 255, %v121_v8  ;;  %v138_v21 = vand.u32 255, %v122_v13  ;;  %v242_v39 = vld [vmem:[#allocation8 + $0x2] sm:$0x1]  ;;  %s506_s12 = sshll.u32 %s787_s5, 4  ;;  %s507_s12 = int_to_ptr.vmem [resolvable:$true] %s506_s12 }
  0x82   :  { %v951_v3 = vsub.s32 0, %v252_v2  ;;  %v139_v22 = vand.u32 255, %v123_v14  ;;  %v124_v46 = vunpack.c.0.s8 %v117_v33  ;;  %v125_v47 = vunpack.c.1.s8 %v117_v33  ;;  %v323_v2 = vld [vmem:[#allocation10 + $0x3] sm:$0x1]  ;;  %v243_v4 = vld [vmem:[#allocation8 + $0x3] sm:$0x1]  ;;  %p745_p5 = scmp.lt.s32.totalorder %s507_s12, %s507_s12 }
  0x83   :  { %v192_v25 = vshra.s32 %v136_v17, 4  ;;  %v193_v26 = vshra.s32 %v137_v18, 4  ;;  %v152_v27 = vand.u32 15, %v136_v17  ;;  %v153_v28 = vand.u32 15, %v137_v18  ;;  %s740_s1 = scalar_lea.vmem %s507_s12, 256 }
  0x84   :  { %v334_v19 = vrot.slane %v329_v9, %v951_v3  ;;  %v254_v20 = vrot.slane %v249_v10, %v951_v3  ;;  %v956_v23 = vrot.slane %v336_v15, %v951_v3  ;;  %v959_v24 = vrot.slane %v256_v16, %v951_v3  ;;  %v969_v9 = vld [vmem:[#allocation7 + $0x10] sm:$0xff]  ;;  %p741_p4 = scmp.ne.s32.totalorder %s507_s12, %s740_s1  ;;  %p746_p6 = scmp.lt.s32.totalorder %s740_s1, %s740_s1 }
  0x85   :  { %v194_v29 = vshra.s32 %v138_v21, 4  ;;  %v195_v30 = vshra.s32 %v139_v22, 4  ;;  %v154_v31 = vand.u32 15, %v138_v21  ;;  %v155_v32 = vand.u32 15, %v139_v22 }
  0x86   :  { %v208_v34 = vcvt.s32.f32 %v192_v25  ;;  %v209_v35 = vcvt.s32.f32 %v193_v26  ;;  %v168_v36 = vcvt.s32.f32 %v152_v27  ;;  %v169_v37 = vcvt.s32.f32 %v153_v28  ;;  %p747_p7 = por %p746_p6, %p745_p5 }
  0x87   :  { %v210_v40 = vcvt.s32.f32 %v194_v29  ;;  %v211_v41 = vcvt.s32.f32 %v195_v30  ;;  %v170_v42 = vcvt.s32.f32 %v154_v31  ;;  %v171_v43 = vcvt.s32.f32 %v155_v32 }
  0x88   :  { %v224_v44 = vpack.c.bf16 %v209_v35, %v208_v34  ;;  %v184_v45 = vpack.c.bf16 %v169_v37, %v168_v36  ;;  %v343_v50 = vpack.i.b16 %v322_v38, %v322_v38  ;;  %v263_v51 = vpack.i.b16 %v242_v39, %v242_v39  ;;  %v324_v34 = vld [vmem:[#allocation10 + $0x4] sm:$0x1]  ;;  %v244_v39 = vld [vmem:[#allocation8 + $0x4] sm:$0x1]  ;;  %p748_p8 = pnand %p747_p7, %p741_p4 }
  0x89   :  { %v225_v48 = vpack.c.bf16 %v211_v41, %v210_v40  ;;  %v185_v49 = vpack.c.bf16 %v171_v43, %v170_v42  ;;  %v786_v52 = vmov 1089487088   ;;  %v140_v55 = vand.u32 255, %v124_v46 }
  0x8a   :  { %v312_v53 = vsub.bf16 %v224_v44, %v786_v52  ;;  %v232_v54 = vsub.bf16 %v184_v45, %v786_v52  ;;  %v141_v56 = vand.u32 255, %v125_v47  ;;  %v348_v59 = vrot.slane %v343_v50, %v951_v3 }
  0x8b   :  { %v313_v57 = vsub.bf16 %v225_v48, %v786_v52  ;;  %v233_v58 = vsub.bf16 %v185_v49, %v786_v52  ;;  %v268_v60 = vrot.slane %v263_v51, %v951_v3  ;;  %v196_v63 = vshra.s32 %v140_v55, 4 }
  0x8c   :  { %v384_v61 = vmul.bf16 %v334_v19, %v312_v53  ;;  %v304_v62 = vmul.bf16 %v254_v20, %v232_v54  ;;  %v197_v0 = vshra.s32 %v141_v56, 4  ;;  %v156_v7 = vand.u32 15, %v140_v55  ;;  %v325_v53 = vld [vmem:[#allocation10 + $0x5] sm:$0x1] }
  0x8d   :  { %v385_v5 = vmul.bf16 %v956_v23, %v313_v57  ;;  %v305_v6 = vmul.bf16 %v959_v24, %v233_v58  ;;  %v157_v8 = vand.u32 15, %v141_v56  ;;  %v212_v10 = vcvt.s32.f32 %v196_v63  ;;  %v245_v58 = vld [vmem:[#allocation8 + $0x5] sm:$0x1]  ;;  %v119_v63 = vld [vmem:[#allocation7 + $0x18] sm:$0xff] }
  0x8e   :  { %545 = vmatpush3.bf16.msra.mxu0 %v384_v61  ;;  %565 = vmatpush3.bf16.msra.mxu1 %v304_v62  ;;  %v213_v11 = vcvt.s32.f32 %v197_v0  ;;  %v126_v12 = vunpack.c.2.s8 %v117_v33  ;;  %v127_v13 = vunpack.c.3.s8 %v117_v33  ;;  %v172_v14 = vcvt.s32.f32 %v156_v7 }
  0x8f   :  { %546 = vmatprep.subr.bf16.mxu0 %v784_v1  ;;  %566 = vmatprep.subr.bf16.mxu1 %v784_v1  ;;  %v173_v15 = vcvt.s32.f32 %v157_v8  ;;  %v350_v16 = vpack.i.b16 %v323_v2, %v323_v2  ;;  %v270_v17 = vpack.i.b16 %v243_v4, %v243_v4  ;;  %v128_v21 = vunpack.c.0.s8 %v969_v9 }
  0x90   :  { %v226_v18 = vpack.c.bf16 %v213_v11, %v212_v10  ;;  %v142_v19 = vand.u32 255, %v126_v12  ;;  %v143_v20 = vand.u32 255, %v127_v13  ;;  %v129_v25 = vunpack.c.1.s8 %v969_v9 }
  0x91   :  { %v186_v22 = vpack.c.bf16 %v173_v15, %v172_v14  ;;  %v355_v23 = vrot.slane %v350_v16, %v951_v3  ;;  %v275_v24 = vrot.slane %v270_v17, %v951_v3  ;;  %v144_v32 = vand.u32 255, %v128_v21 }
  0x92   :  { %547 = vmatpush3.bf16.msra.mxu0 %v385_v5  ;;  %567 = vmatpush3.bf16.msra.mxu1 %v305_v6  ;;  %v314_v26 = vsub.bf16 %v226_v18, %v786_v52  ;;  %v198_v27 = vshra.s32 %v142_v19, 4  ;;  %v199_v28 = vshra.s32 %v143_v20, 4  ;;  %v158_v29 = vand.u32 15, %v142_v19 }
  0x93   :  { %548 = vmatprep.subr.bf16.mxu0 %v784_v1  ;;  %568 = vmatprep.subr.bf16.mxu1 %v784_v1  ;;  %v234_v30 = vsub.bf16 %v186_v22, %v786_v52  ;;  %v159_v31 = vand.u32 15, %v143_v20  ;;  %v145_v33 = vand.u32 255, %v129_v25  ;;  %v200_v42 = vshra.s32 %v144_v32, 4  ;;  %v246_v22 = vld [vmem:[#allocation8 + $0x6] sm:$0x1] }
  0x94   :  { %v386_v35 = vmul.bf16 %v348_v59, %v314_v26  ;;  %v214_v36 = vcvt.s32.f32 %v198_v27  ;;  %v215_v37 = vcvt.s32.f32 %v199_v28  ;;  %v174_v38 = vcvt.s32.f32 %v158_v29 }
  0x95   :  { %v306_v40 = vmul.bf16 %v268_v60, %v234_v30  ;;  %v175_v41 = vcvt.s32.f32 %v159_v31  ;;  %v201_v43 = vshra.s32 %v145_v33, 4  ;;  %v357_v45 = vpack.i.b16 %v324_v34, %v324_v34 }
  0x96   :  { %549 = vmatpush3.bf16.msra.mxu0 %v386_v35  ;;  %v227_v44 = vpack.c.bf16 %v215_v37, %v214_v36  ;;  %v160_v46 = vand.u32 15, %v144_v32  ;;  %v161_v47 = vand.u32 15, %v145_v33  ;;  %v216_v49 = vcvt.s32.f32 %v200_v42 }
  0x97   :  { %569 = vmatpush3.bf16.msra.mxu1 %v306_v40  ;;  %550 = vmatprep.subr.bf16.mxu0 %v784_v1  ;;  %v187_v48 = vpack.c.bf16 %v175_v41, %v174_v38  ;;  %v217_v50 = vcvt.s32.f32 %v201_v43  ;;  %v277_v51 = vpack.i.b16 %v244_v39, %v244_v39  ;;  %v362_v55 = vrot.slane %v357_v45, %v951_v3 }
  0x98   :  { %570 = vmatprep.subr.bf16.mxu1 %v784_v1  ;;  %v315_v54 = vsub.bf16 %v227_v44, %v786_v52  ;;  %v176_v56 = vcvt.s32.f32 %v160_v46  ;;  %v177_v57 = vcvt.s32.f32 %v161_v47  ;;  %v130_v62 = vunpack.c.2.s8 %v969_v9  ;;  %v327_v46 = vld [vmem:[#allocation10 + $0x7] sm:$0x1] }
  0x99   :  { %v235_v59 = vsub.bf16 %v187_v48, %v786_v52  ;;  %v228_v60 = vpack.c.bf16 %v217_v50, %v216_v49  ;;  %v282_v61 = vrot.slane %v277_v51, %v951_v3  ;;  %v131_v4 = vunpack.c.3.s8 %v969_v9  ;;  %v326_v9 = vld [vmem:[#allocation10 + $0x6] sm:$0x1]  ;;  %v247_v51 = vld [vmem:[#allocation8 + $0x7] sm:$0x1] }
  0x9a   :  { %v387_v0 = vmul.bf16 %v355_v23, %v315_v54  ;;  %v188_v2 = vpack.c.bf16 %v177_v57, %v176_v56  ;;  %v364_v5 = vpack.i.b16 %v325_v53, %v325_v53  ;;  %v146_v8 = vand.u32 255, %v130_v62 }
  0x9b   :  { %v307_v6 = vmul.bf16 %v275_v24, %v235_v59  ;;  %v316_v7 = vsub.bf16 %v228_v60, %v786_v52  ;;  %v284_v10 = vpack.i.b16 %v245_v58, %v245_v58  ;;  %v147_v12 = vand.u32 255, %v131_v4 }
  0x9c   :  { %551 = vmatpush3.bf16.msra.mxu0 %v387_v0  ;;  %v236_v11 = vsub.bf16 %v188_v2, %v786_v52  ;;  %v132_v13 = vunpack.c.0.s8 %v119_v63  ;;  %v202_v15 = vshra.s32 %v146_v8, 4  ;;  %v369_v16 = vrot.slane %v364_v5, %v951_v3 }
  0x9d   :  { %571 = vmatpush3.bf16.msra.mxu1 %v307_v6  ;;  %552 = vmatprep.subr.bf16.mxu0 %v784_v1  ;;  %v388_v14 = vmul.bf16 %v362_v55, %v316_v7  ;;  %v162_v17 = vand.u32 15, %v146_v8  ;;  %v203_v19 = vshra.s32 %v147_v12, 4  ;;  %v163_v20 = vand.u32 15, %v147_v12 }
  0x9e   :  { %572 = vmatprep.subr.bf16.mxu1 %v784_v1  ;;  %v308_v18 = vmul.bf16 %v282_v61, %v236_v11  ;;  %v133_v21 = vunpack.c.1.s8 %v119_v63  ;;  %v218_v23 = vcvt.s32.f32 %v202_v15  ;;  %v289_v25 = vrot.slane %v284_v10, %v951_v3 }
  0x9f   :  { %v178_v24 = vcvt.s32.f32 %v162_v17  ;;  %v148_v26 = vand.u32 255, %v132_v13  ;;  %v219_v27 = vcvt.s32.f32 %v203_v19  ;;  %v179_v28 = vcvt.s32.f32 %v163_v20 }
  0xa0   :  { %553 = vmatpush3.bf16.msra.mxu0 %v388_v14  ;;  %v149_v29 = vand.u32 255, %v133_v21  ;;  %v371_v30 = vpack.i.b16 %v326_v9, %v326_v9  ;;  %v291_v33 = vpack.i.b16 %v246_v22, %v246_v22  ;;  %v134_v34 = vunpack.c.2.s8 %v119_v63  ;;  %v600_v9 = vld [vmem:[#allocation5] sm:$0xff]   ;;  %v525_v21 = vld [vmem:[#allocation11] ss:$0 sm:$0xff] }
  0xa1   :  { %573 = vmatpush3.bf16.msra.mxu1 %v308_v18  ;;  %554 = vmatprep.subr.bf16.mxu0 %v784_v1  ;;  %v204_v31 = vshra.s32 %v148_v26, 4  ;;  %v164_v32 = vand.u32 15, %v148_v26  ;;  %v229_v35 = vpack.c.bf16 %v219_v27, %v218_v23  ;;  %v189_v36 = vpack.c.bf16 %v179_v28, %v178_v24  ;;  %v601_v18 = vld [vmem:[#allocation2] sm:$0xff]  }
  0xa2   :  { %574 = vmatprep.subr.bf16.mxu1 %v784_v1  ;;  %v205_v37 = vshra.s32 %v149_v29, 4  ;;  %v165_v38 = vand.u32 15, %v149_v29  ;;  %v135_v41 = vunpack.c.3.s8 %v119_v63  ;;  %v376_v47 = vrot.slane %v371_v30, %v951_v3 }
  0xa3   :  { %v220_v39 = vcvt.s32.f32 %v204_v31  ;;  %v180_v40 = vcvt.s32.f32 %v164_v32  ;;  %v317_v42 = vsub.bf16 %v229_v35, %v786_v52  ;;  %v237_v43 = vsub.bf16 %v189_v36, %v786_v52 }
  0xa4   :  { %v221_v44 = vcvt.s32.f32 %v205_v37  ;;  %v181_v45 = vcvt.s32.f32 %v165_v38  ;;  %v296_v48 = vrot.slane %v291_v33, %v951_v3  ;;  %v150_v49 = vand.u32 255, %v134_v34 }
  0xa5   :  { %v151_v50 = vand.u32 255, %v135_v41  ;;  %v389_v53 = vmul.bf16 %v369_v16, %v317_v42  ;;  %v309_v54 = vmul.bf16 %v289_v25, %v237_v43  ;;  %v378_v59 = vpack.i.b16 %v327_v46, %v327_v46 }
  0xa6   :  { %v230_v55 = vpack.c.bf16 %v221_v44, %v220_v39  ;;  %v190_v56 = vpack.c.bf16 %v181_v45, %v180_v40  ;;  %v206_v57 = vshra.s32 %v150_v49, 4  ;;  %v166_v60 = vand.u32 15, %v150_v49 }
  0xa7   :  { %v207_v58 = vshra.s32 %v151_v50, 4  ;;  %555 = vmatpush3.bf16.msra.mxu0 %v389_v53  ;;  %575 = vmatpush3.bf16.msra.mxu1 %v309_v54  ;;  %v167_v63 = vand.u32 15, %v151_v50  ;;  %v298_v0 = vpack.i.b16 %v247_v51, %v247_v51  ;;  %v383_v11 = vrot.slane %v378_v59, %v951_v3 }
  0xa8   :  { %v318_v61 = vsub.bf16 %v230_v55, %v786_v52  ;;  %v238_v62 = vsub.bf16 %v190_v56, %v786_v52  ;;  %556 = vmatprep.subr.bf16.mxu0 %v784_v1  ;;  %576 = vmatprep.subr.bf16.mxu1 %v784_v1  ;;  %v222_v2 = vcvt.s32.f32 %v206_v57  ;;  %v182_v5 = vcvt.s32.f32 %v166_v60 }
  0xa9   :  { %v223_v4 = vcvt.s32.f32 %v207_v58  ;;  %v183_v8 = vcvt.s32.f32 %v167_v63  ;;  %v303_v13 = vrot.slane %v298_v0, %v951_v3 }
  0xaa   :  { %v390_v6 = vmul.bf16 %v376_v47, %v318_v61  ;;  %v310_v7 = vmul.bf16 %v296_v48, %v238_v62 }
  0xab   :  { %v231_v10 = vpack.c.bf16 %v223_v4, %v222_v2  ;;  %v191_v12 = vpack.c.bf16 %v183_v8, %v182_v5 }
  0xac   :  { %557 = vmatpush3.bf16.msra.mxu0 %v390_v6  ;;  %577 = vmatpush3.bf16.msra.mxu1 %v310_v7 }
  0xad   :  { %558 = vmatprep.subr.bf16.mxu0 %v784_v1  ;;  %578 = vmatprep.subr.bf16.mxu1 %v784_v1  ;;  %v319_v14 = vsub.bf16 %v231_v10, %v786_v52  ;;  %v239_v15 = vsub.bf16 %v191_v12, %v786_v52 }
  0xaf   :  { %v391_v16 = vmul.bf16 %v383_v11, %v319_v14  ;;  %v311_v17 = vmul.bf16 %v303_v13, %v239_v15 }
  0xb1   :  { %559 = vmatpush3.bf16.msra.mxu0 %v391_v16  ;;  %579 = vmatpush3.bf16.msra.mxu1 %v311_v17 }
  0xb4   :  { %561 = vmatmul.mubr.bf16.vlgmr.msra.gmra.mrb[0].mxu0 %v600_v9  ;;  %581 = vmatmul.mubr.bf16.vlgmr.msra.gmra.mrb[0].mxu1 %v601_v18 }
 0x187   :  { %v436_v19 = vpop.f32.mrb[0].mxu0  ;;  %v483_v20 = vpop.f32.mrb[0].mxu1 }
 0x188   :  { %v562_v3 = vpop.f32.mrb[1].mxu0  ;;  %v484_v22 = vadd.f32 %v483_v20, %v436_v19  ;;  %v582_v23 = vpop.f32.mrb[1].mxu1 }
 0x189   :  { %v439_v24 = vpop.f32.mrb[2].mxu0  ;;  %v486_v1 = vpop.f32.mrb[2].mxu1 }
 0x18a   :  { %v563_v25 = vpop.f32.mrb[3].mxu0  ;;  %v497_v52 = vadd.f32 %v525_v21, %v484_v22  ;;  %v487_v26 = vadd.f32 %v486_v1, %v439_v24  ;;  %v583_v27 = vpop.f32.mrb[3].mxu1 }
 0x18c   :  { %499 = vst [vmem:[#allocation13] sm:$0xff] %v497_v52  ;;  %v498_v28 = vadd.f32 %v525_v21, %v487_v26 }
 0x18e   :  { %500 = vst [vmem:[#allocation13 + $0x8] sm:$0xff] %v498_v28 }
 0x18f   :  { %751 = shalt.err (!%p748_p8)
}
 0x190   :  { %s752_s15 = scalar_lea.hbm %s1032_s6, 256 }
 0x191   :  { %p753_p9 = scmp.ne.s32.totalorder %s1032_s6, %s752_s15  ;;  %p756_p10 = scmp.lt.u32.totalorder %s752_s15, %s1032_s6 }
 0x193   :  { %p758_p11 = pnand %p756_p10, %p753_p9 }
 0x195   :  { %761 = shalt.err (!%p758_p11)
}
 0x196   :  { %512 = dma.vmem_to_hbm [thread:$0]  %s507_s12, 256, %s1032_s6, [#allocation4], %s774_s13, %s774_s13, %s781_s14  }
 0x197   :  { %770 = dma.done.wait [#allocation4], 256  }
 0x198   :  { %771 = vsyncadd [#allocation4], 4294967040 }
 0x199   :  { %516 = vsyncpa [#allocation3], 1 }
 0x19a   :  { %517 = vsyncpa [#allocation6], 1 }
 0x19b   :  { %518 = vsyncpa [#allocation9], 1 }
 0x19c   :  { %519 = vsyncpa [#allocation12], 1 }
 0x19d   :  { %520 = vsyncpa [#allocation4], 1 }

</bundles_post_ra>
